<compile_context>
chip_gen: v7x
topology: tpu7x:2x2x1
jax: 0.10.0
libtpu: 0.0.40
codegen_flags: <defaults>
</compile_context>

<pallas_src>
import functools

import jax
import jax.numpy as jnp
from jax.experimental import pallas as pl
from jax.experimental.pallas import tpu as pltpu

LN_EPS = 1e-5   # PyTorch nn.LayerNorm default
LANE = 128      # TPU lane width: HBM-facing last dim is padded to this


def _round_up(x, m):
    return (x + m - 1) // m * m


# -----------------------------------------------------------------------------
# Kernel: one full transformer layer for one batch element.
# -----------------------------------------------------------------------------
def fused_layer_kernel(x_ref, ln1g_ref, ln1b_ref, wqkv_ref, wout_ref, bout_ref,
                       ln2g_ref, ln2b_ref, w1_ref, b1_ref, w2_ref, b2_ref,
                       o_ref, *, true_dim, heads, dim_head):
    f32 = jnp.float32
    cdt = wqkv_ref.dtype               # MXU operand dtype (bf16 by default)
    seq = x_ref.shape[1]
    inner = heads * dim_head
    scale = dim_head ** -0.5
    inv_d = 1.0 / true_dim

    def layernorm(z, g, b):
        # z: (N, Dp) f32 with lanes >= true_dim identically zero, so plain
        # lane sums divided by the TRUE dim give exact (biased) statistics.
        mean = jnp.sum(z, axis=-1, keepdims=True) * inv_d
        var = jnp.sum(z * z, axis=-1, keepdims=True) * inv_d - mean * mean
        # gamma/beta are zero on padded lanes -> LN output stays zero there.
        return (z - mean) * jax.lax.rsqrt(var + LN_EPS) * g + b

    x = x_ref[0].astype(f32)                                       # (N, Dp)

    # ------------------------- PreNorm + Attention -------------------------
    y = layernorm(x, ln1g_ref[0].astype(f32), ln1b_ref[0].astype(f32))
    # Single fused QKV projection: one lane-wide matmul instead of 3*heads
    # dh-wide ones.
    qkv = jnp.dot(y.astype(cdt), wqkv_ref[...],
                  preferred_element_type=f32)                      # (N, 3*inner)
    # Split heads: columns are ordered [chunk][head][dh] (torch chunk + '(h d)').
    qkv = jnp.swapaxes(qkv.reshape(seq, 3 * heads, dim_head), 0, 1)
    qkv = qkv.astype(cdt)                                          # (3h, N, dh)
    q, k, v = qkv[:heads], qkv[heads:2 * heads], qkv[2 * heads:]

    s = jnp.einsum('hid,hjd->hij', q, k,
                   preferred_element_type=f32) * scale             # (h, N, N)
    s = s - jnp.max(s, axis=-1, keepdims=True)
    p = jnp.exp(s)
    attn = (p / jnp.sum(p, axis=-1, keepdims=True)).astype(cdt)    # exact softmax

    o = jnp.einsum('hij,hjd->hid', attn, v,
                   preferred_element_type=f32)                     # (h, N, dh)
    # Concatenate heads -> one (N, inner) @ (inner, Dp) output projection.
    o = jnp.swapaxes(o, 0, 1).reshape(seq, inner)                  # (N, inner)
    x2 = (jnp.dot(o.astype(cdt), wout_ref[...], preferred_element_type=f32)
          + bout_ref[0].astype(f32) + x)

    # ------------------------ PreNorm + FeedForward ------------------------
    y2 = layernorm(x2, ln2g_ref[0].astype(f32), ln2b_ref[0].astype(f32))
    h1 = jnp.dot(y2.astype(cdt), w1_ref[...], preferred_element_type=f32)
    h1 = jnp.maximum(h1 + b1_ref[0].astype(f32), 0.0)              # ReLU
    out = (jnp.dot(h1.astype(cdt), w2_ref[...], preferred_element_type=f32)
           + b2_ref[0].astype(f32) + x2)

    o_ref[0] = out.astype(o_ref.dtype)         # (N, Dp): lane-dense, unmasked


# -----------------------------------------------------------------------------
# Wrappers
# -----------------------------------------------------------------------------
def fused_layer(x, layer, *, heads, dim_head, true_dim):
    B, N, Dp = x.shape
    inner = heads * dim_head
    H = layer["w1"].shape[1]

    def _const(shape):
        # Constant-index weight/bias spec: DMA'd into VMEM once, resident
        # across the (parallel) batch grid.
        return pl.BlockSpec(shape, lambda b: (0,) * len(shape))

    kernel = functools.partial(fused_layer_kernel, true_dim=true_dim,
                               heads=heads, dim_head=dim_head)
    return pl.pallas_call(
        kernel,
        out_shape=jax.ShapeDtypeStruct((B, N, Dp), x.dtype),
        grid=(B,),   # batch-parallel; length >= 2 keeps both v7x TCs busy
        in_specs=[
            pl.BlockSpec((1, N, Dp), lambda b: (b, 0, 0)),   # x (lane-dense)
            _const((1, Dp)),            # ln1 gamma
            _const((1, Dp)),            # ln1 beta
            _const((Dp, 3 * inner)),    # fused Wqkv
            _const((inner, Dp)),        # Wout
            _const((1, Dp)),            # bout
            _const((1, Dp)),            # ln2 gamma
            _const((1, Dp)),            # ln2 beta
            _const((Dp, H)),            # W1
            _const((1, H)),             # b1
            _const((H, Dp)),            # W2
            _const((1, Dp)),            # b2
        ],
        out_specs=pl.BlockSpec((1, N, Dp), lambda b: (b, 0, 0)),
        compiler_params=pltpu.CompilerParams(
            dimension_semantics=("parallel",),
            # 48 MiB leaves headroom on v7x (64 MiB/TC physical); well within
            # v5e/v6e's 128 MiB.
            vmem_limit_bytes=48 * 1024 * 1024),
    )(x, layer["ln1_g"], layer["ln1_b"], layer["wqkv"], layer["wout"],
      layer["bout"], layer["ln2_g"], layer["ln2_b"],
      layer["w1"], layer["b1"], layer["w2"], layer["b2"])


def preprocess_params(params, *, compute_dtype=jnp.bfloat16, lane=LANE):
    """One-time weight preprocessing (NOT per forward call): zero-pad the
    embedding dim to a lane multiple and cast matmul weights to the MXU
    operand dtype.  Pads are zero so the padded lanes are exact no-ops."""
    prepared = []
    for p in params:
        D = p["wqkv"].shape[0]
        pad = _round_up(D, lane) - D
        rows = lambda w: jnp.pad(w, ((0, pad), (0, 0)))   # pad input-feature rows
        cols = lambda w: jnp.pad(w, ((0, 0), (0, pad)))   # pad output-feature cols
        prepared.append({
            "ln1_g": cols(p["ln1_g"]).astype(jnp.float32),
            "ln1_b": cols(p["ln1_b"]).astype(jnp.float32),
            "wqkv":  rows(p["wqkv"]).astype(compute_dtype),
            "wout":  cols(p["wout"]).astype(compute_dtype),
            "bout":  cols(p["bout"]).astype(jnp.float32),
            "ln2_g": cols(p["ln2_g"]).astype(jnp.float32),
            "ln2_b": cols(p["ln2_b"]).astype(jnp.float32),
            "w1":    rows(p["w1"]).astype(compute_dtype),
            "b1":    p["b1"].astype(jnp.float32),
            "w2":    cols(p["w2"]).astype(compute_dtype),
            "b2":    cols(p["b2"]).astype(jnp.float32),
        })
    return prepared


def transformer_forward(x, prepared_layers, *, heads, dim_head):
    """x: (B, N, D).  prepared_layers: output of preprocess_params (call it
    once at init, not per step)."""
    B, N, D = x.shape
    Dp = prepared_layers[0]["wqkv"].shape[0]
    xp = jnp.pad(x, ((0, 0), (0, 0), (0, Dp - D))) if Dp != D else x
    # TODO(synk): if per-layer weight DMA becomes exposed at small B*N*D, add
    # a cross-pallas_call weight-prefetch future (P10) for the next layer.
    for layer in prepared_layers:
        xp = fused_layer(xp, layer, heads=heads, dim_head=dim_head, true_dim=D)
    return xp[..., :D] if Dp != D else xp


# -----------------------------------------------------------------------------
# Params + pure-JAX reference (for sanity check)
# -----------------------------------------------------------------------------
def init_params(key, *, dim, depth, heads, dim_head, mlp_dim):
    inner = heads * dim_head
    params = []
    for _ in range(depth):
        keys = jax.random.split(key, 10)
        key = keys[0]
        params.append({
            "ln1_g": 1.0 + 0.1 * jax.random.normal(keys[7], (1, dim), jnp.float32),
            "ln1_b": 0.05 * jax.random.normal(keys[8], (1, dim), jnp.float32),
            "wqkv": jax.random.normal(keys[1], (dim, 3 * inner), jnp.float32) * 0.05,
            "wout": jax.random.normal(keys[2], (inner, dim), jnp.float32) * 0.05,
            "bout": jax.random.normal(keys[3], (1, dim), jnp.float32) * 0.01,
            "ln2_g": 1.0 + 0.1 * jax.random.normal(keys[9], (1, dim), jnp.float32),
            "ln2_b": jnp.zeros((1, dim), jnp.float32),
            "w1": jax.random.normal(keys[4], (dim, mlp_dim), jnp.float32) * 0.05,
            "b1": jax.random.normal(keys[5], (1, mlp_dim), jnp.float32) * 0.01,
            "w2": jax.random.normal(keys[6], (mlp_dim, dim), jnp.float32) * 0.05,
            "b2": jnp.zeros((1, dim), jnp.float32),
        })
    return params


def reference_forward(x, params, *, heads, dim_head):
    inner = heads * dim_head
    B, N, _ = x.shape

    def ln(z, g, b):
        m = jnp.mean(z, axis=-1, keepdims=True)
        v = jnp.mean((z - m) ** 2, axis=-1, keepdims=True)
        return (z - m) / jnp.sqrt(v + LN_EPS) * g + b

    def split_heads(t):
        return t.reshape(B, N, heads, dim_head).transpose(0, 2, 1, 3)

    for p in params:
        y = ln(x, p["ln1_g"][0], p["ln1_b"][0])
        q, k, v = jnp.split(y @ p["wqkv"], 3, axis=-1)
        q, k, v = split_heads(q), split_heads(k), split_heads(v)
        s = jnp.einsum('bhid,bhjd->bhij', q, k) * dim_head ** -0.5
        a = jax.nn.softmax(s, axis=-1)
        o = jnp.einsum('bhij,bhjd->bhid', a, v)
        o = o.transpose(0, 2, 1, 3).reshape(B, N, inner)
        x = o @ p["wout"] + p["bout"][0] + x
        y2 = ln(x, p["ln2_g"][0], p["ln2_b"][0])
        h = jnp.maximum(y2 @ p["w1"] + p["b1"][0], 0.0)
        x = h @ p["w2"] + p["b2"][0] + x
    return x


if __name__ == "__main__":
    # Small shapes consistent with the module: batch=2, seq=8, dim=32
    B, N, DIM = 2, 8, 32
    DEPTH, HEADS, DIM_HEAD, MLP_DIM = 2, 4, 16, 64

    key = jax.random.PRNGKey(0)
    kx, kp = jax.random.split(key)
    x = jax.random.normal(kx, (B, N, DIM), jnp.float32)
    params = init_params(kp, dim=DIM, depth=DEPTH, heads=HEADS,
                         dim_head=DIM_HEAD, mlp_dim=MLP_DIM)
    ref = reference_forward(x, params, heads=HEADS, dim_head=DIM_HEAD)

    # Exact path: f32 MXU operands (validates the fused-kernel math).
    prep_f32 = preprocess_params(params, compute_dtype=jnp.float32)
    out_f32 = jax.block_until_ready(
        transformer_forward(x, prep_f32, heads=HEADS, dim_head=DIM_HEAD))
    assert out_f32.shape == (B, N, DIM)
    assert jnp.allclose(out_f32, ref, rtol=1e-4, atol=1e-4), \
        float(jnp.max(jnp.abs(out_f32 - ref)))

    # Production path: bf16 MXU operands, f32 accumulation / statistics.
    prep_bf16 = preprocess_params(params, compute_dtype=jnp.bfloat16)
    out_bf16 = jax.block_until_ready(
        transformer_forward(x, prep_bf16, heads=HEADS, dim_head=DIM_HEAD))
    assert out_bf16.shape == (B, N, DIM)
    assert jnp.allclose(out_bf16, ref, rtol=2e-2, atol=2e-2), \
        float(jnp.max(jnp.abs(out_bf16 - ref)))

    print("KERNEL_OK")
</pallas_src>

<mosaic_0001>
module attributes {stable_mosaic.version = 11 : i64} {
  func.func @fused_layer_kernel(%arg0: i32, %arg1: memref<1x8x128xf32, #tpu.memory_space<vmem>>, %arg2: memref<1x128xf32, #tpu.memory_space<vmem>>, %arg3: memref<1x128xf32, #tpu.memory_space<vmem>>, %arg4: memref<128x192xf32, #tpu.memory_space<vmem>>, %arg5: memref<64x128xf32, #tpu.memory_space<vmem>>, %arg6: memref<1x128xf32, #tpu.memory_space<vmem>>, %arg7: memref<1x128xf32, #tpu.memory_space<vmem>>, %arg8: memref<1x128xf32, #tpu.memory_space<vmem>>, %arg9: memref<128x64xf32, #tpu.memory_space<vmem>>, %arg10: memref<1x64xf32, #tpu.memory_space<vmem>>, %arg11: memref<64x128xf32, #tpu.memory_space<vmem>>, %arg12: memref<1x128xf32, #tpu.memory_space<vmem>>, %arg13: memref<1x8x128xf32, #tpu.memory_space<vmem>>) attributes {dimension_semantics = [#tpu.dimension_semantics<parallel>], iteration_bounds = array<i64: 2>, scalar_prefetch = 0 : i64, scratch_operands = 0 : i64, tpu.core_type = #tpu.core_type<tc>, window_params = [{transform_indices = @transform_0, window_bounds = array<i64: 1, 8, 128>}, {pipeline_mode = #tpu.pipeline_mode<synchronous>, transform_indices = @transform_1, window_bounds = array<i64: 1, 128>}, {pipeline_mode = #tpu.pipeline_mode<synchronous>, transform_indices = @transform_2, window_bounds = array<i64: 1, 128>}, {pipeline_mode = #tpu.pipeline_mode<synchronous>, transform_indices = @transform_3, window_bounds = array<i64: 128, 192>}, {pipeline_mode = #tpu.pipeline_mode<synchronous>, transform_indices = @transform_4, window_bounds = array<i64: 64, 128>}, {pipeline_mode = #tpu.pipeline_mode<synchronous>, transform_indices = @transform_5, window_bounds = array<i64: 1, 128>}, {pipeline_mode = #tpu.pipeline_mode<synchronous>, transform_indices = @transform_6, window_bounds = array<i64: 1, 128>}, {pipeline_mode = #tpu.pipeline_mode<synchronous>, transform_indices = @transform_7, window_bounds = array<i64: 1, 128>}, {pipeline_mode = #tpu.pipeline_mode<synchronous>, transform_indices = @transform_8, window_bounds = array<i64: 128, 64>}, {pipeline_mode = #tpu.pipeline_mode<synchronous>, transform_indices = @transform_9, window_bounds = array<i64: 1, 64>}, {pipeline_mode = #tpu.pipeline_mode<synchronous>, transform_indices = @transform_10, window_bounds = array<i64: 64, 128>}, {pipeline_mode = #tpu.pipeline_mode<synchronous>, transform_indices = @transform_11, window_bounds = array<i64: 1, 128>}, {transform_indices = @transform_12, window_bounds = array<i64: 1, 8, 128>}]} {
    %c0 = arith.constant 0 : index
    %c0_0 = arith.constant 0 : index
    %c0_1 = arith.constant 0 : index
    %0 = vector.load %arg1[%c0, %c0_0, %c0_1] : memref<1x8x128xf32, #tpu.memory_space<vmem>>, vector<1x8x128xf32>
    %1 = vector.shape_cast %0 : vector<1x8x128xf32> to vector<8x128xf32>
    %c0_2 = arith.constant 0 : index
    %c0_3 = arith.constant 0 : index
    %2 = vector.load %arg2[%c0_2, %c0_3] : memref<1x128xf32, #tpu.memory_space<vmem>>, vector<1x128xf32>
    %3 = vector.shape_cast %2 : vector<1x128xf32> to vector<128xf32>
    %c0_4 = arith.constant 0 : index
    %c0_5 = arith.constant 0 : index
    %4 = vector.load %arg3[%c0_4, %c0_5] : memref<1x128xf32, #tpu.memory_space<vmem>>, vector<1x128xf32>
    %5 = vector.shape_cast %4 : vector<1x128xf32> to vector<128xf32>
    %cst = arith.constant dense<0.000000e+00> : vector<8xf32>
    %6 = vector.multi_reduction <add>, %1, %cst [1] : vector<8x128xf32> to vector<8xf32>
    %7 = vector.shape_cast %6 : vector<8xf32> to vector<8x1xf32>
    %cst_6 = arith.constant 3.125000e-02 : f32
    %8 = vector.broadcast %cst_6 : f32 to vector<8x1xf32>
    %9 = arith.mulf %7, %8 : vector<8x1xf32>
    %10 = arith.mulf %1, %1 : vector<8x128xf32>
    %cst_7 = arith.constant dense<0.000000e+00> : vector<8xf32>
    %11 = vector.multi_reduction <add>, %10, %cst_7 [1] : vector<8x128xf32> to vector<8xf32>
    %12 = vector.shape_cast %11 : vector<8xf32> to vector<8x1xf32>
    %cst_8 = arith.constant 3.125000e-02 : f32
    %13 = vector.broadcast %cst_8 : f32 to vector<8x1xf32>
    %14 = arith.mulf %12, %13 : vector<8x1xf32>
    %15 = arith.mulf %9, %9 : vector<8x1xf32>
    %16 = arith.subf %14, %15 : vector<8x1xf32>
    %17 = vector.broadcast %9 : vector<8x1xf32> to vector<8x128xf32>
    %18 = arith.subf %1, %17 : vector<8x128xf32>
    %cst_9 = arith.constant 9.99999974E-6 : f32
    %19 = vector.broadcast %cst_9 : f32 to vector<8x1xf32>
    %20 = arith.addf %16, %19 : vector<8x1xf32>
    %21 = math.rsqrt %20 : vector<8x1xf32>
    %22 = vector.broadcast %21 : vector<8x1xf32> to vector<8x128xf32>
    %23 = arith.mulf %18, %22 : vector<8x128xf32>
    %24 = vector.shape_cast %3 : vector<128xf32> to vector<1x128xf32>
    %25 = vector.broadcast %24 : vector<1x128xf32> to vector<8x128xf32>
    %26 = arith.mulf %23, %25 : vector<8x128xf32>
    %27 = vector.shape_cast %5 : vector<128xf32> to vector<1x128xf32>
    %28 = vector.broadcast %27 : vector<1x128xf32> to vector<8x128xf32>
    %29 = arith.addf %26, %28 : vector<8x128xf32>
    %c0_10 = arith.constant 0 : index
    %c0_11 = arith.constant 0 : index
    %30 = vector.load %arg4[%c0_10, %c0_11] : memref<128x192xf32, #tpu.memory_space<vmem>>, vector<128x192xf32>
    %cst_12 = arith.constant dense<0.000000e+00> : vector<8x192xf32>
    %31 = tpu.matmul %29, %30, %cst_12 {dimension_numbers = #tpu.dot_dimension_numbers<[1], [0], [0], [1], [0, 0, 1, 1], [], []>} : vector<8x128xf32>, vector<128x192xf32>, vector<8x192xf32> -> vector<8x192xf32>
    %32 = vector.shape_cast %31 : vector<8x192xf32> to vector<8x12x16xf32>
    %33 = tpu.transpose %32, [1, 0, 2] : vector<8x12x16xf32> -> vector<12x8x16xf32>
    %34 = vector.extract_strided_slice %33 {offsets = [0, 0, 0], sizes = [4, 8, 16], strides = [1, 1, 1]} : vector<12x8x16xf32> to vector<4x8x16xf32>
    %35 = vector.extract_strided_slice %33 {offsets = [4, 0, 0], sizes = [4, 8, 16], strides = [1, 1, 1]} : vector<12x8x16xf32> to vector<4x8x16xf32>
    %36 = vector.extract_strided_slice %33 {offsets = [8, 0, 0], sizes = [4, 8, 16], strides = [1, 1, 1]} : vector<12x8x16xf32> to vector<4x8x16xf32>
    "tpu.trace_start"() <{level = 10 : i32, message = "hid,hjd->hij"}> : () -> ()
    %cst_13 = arith.constant dense<0.000000e+00> : vector<4x8x8xf32>
    %37 = tpu.matmul %34, %35, %cst_13 {dimension_numbers = #tpu.dot_dimension_numbers<[2], [2], [1], [1], [0, 0, 0, 1, 1, 1], [0], [0]>} : vector<4x8x16xf32>, vector<4x8x16xf32>, vector<4x8x8xf32> -> vector<4x8x8xf32>
    "tpu.trace_stop"() : () -> ()
    %cst_14 = arith.constant 2.500000e-01 : f32
    %38 = vector.broadcast %cst_14 : f32 to vector<4x8x8xf32>
    %39 = arith.mulf %37, %38 : vector<4x8x8xf32>
    %cst_15 = arith.constant dense<0xFF800000> : vector<4x8xf32>
    %40 = vector.multi_reduction <maximumf>, %39, %cst_15 [2] : vector<4x8x8xf32> to vector<4x8xf32>
    %41 = vector.shape_cast %40 : vector<4x8xf32> to vector<4x8x1xf32>
    %42 = vector.broadcast %41 : vector<4x8x1xf32> to vector<4x8x8xf32>
    %43 = arith.subf %39, %42 : vector<4x8x8xf32>
    %44 = math.exp %43 : vector<4x8x8xf32>
    %cst_16 = arith.constant dense<0.000000e+00> : vector<4x8xf32>
    %45 = vector.multi_reduction <add>, %44, %cst_16 [2] : vector<4x8x8xf32> to vector<4x8xf32>
    %46 = vector.shape_cast %45 : vector<4x8xf32> to vector<4x8x1xf32>
    %47 = vector.broadcast %46 : vector<4x8x1xf32> to vector<4x8x8xf32>
    %48 = arith.divf %44, %47 : vector<4x8x8xf32>
    "tpu.trace_start"() <{level = 10 : i32, message = "hij,hjd->hid"}> : () -> ()
    %cst_17 = arith.constant dense<0.000000e+00> : vector<4x8x16xf32>
    %49 = tpu.matmul %48, %36, %cst_17 {dimension_numbers = #tpu.dot_dimension_numbers<[2], [1], [1], [2], [0, 0, 0, 1, 1, 2], [0], [0]>} : vector<4x8x8xf32>, vector<4x8x16xf32>, vector<4x8x16xf32> -> vector<4x8x16xf32>
    "tpu.trace_stop"() : () -> ()
    %50 = tpu.transpose %49, [1, 0, 2] : vector<4x8x16xf32> -> vector<8x4x16xf32>
    %51 = vector.shape_cast %50 : vector<8x4x16xf32> to vector<8x64xf32>
    %c0_18 = arith.constant 0 : index
    %c0_19 = arith.constant 0 : index
    %52 = vector.load %arg5[%c0_18, %c0_19] : memref<64x128xf32, #tpu.memory_space<vmem>>, vector<64x128xf32>
    %cst_20 = arith.constant dense<0.000000e+00> : vector<8x128xf32>
    %53 = tpu.matmul %51, %52, %cst_20 {dimension_numbers = #tpu.dot_dimension_numbers<[1], [0], [0], [1], [0, 0, 1, 1], [], []>} : vector<8x64xf32>, vector<64x128xf32>, vector<8x128xf32> -> vector<8x128xf32>
    %c0_21 = arith.constant 0 : index
    %c0_22 = arith.constant 0 : index
    %54 = vector.load %arg6[%c0_21, %c0_22] : memref<1x128xf32, #tpu.memory_space<vmem>>, vector<1x128xf32>
    %55 = vector.shape_cast %54 : vector<1x128xf32> to vector<128xf32>
    %56 = vector.shape_cast %55 : vector<128xf32> to vector<1x128xf32>
    %57 = vector.broadcast %56 : vector<1x128xf32> to vector<8x128xf32>
    %58 = arith.addf %53, %57 : vector<8x128xf32>
    %59 = arith.addf %58, %1 : vector<8x128xf32>
    %c0_23 = arith.constant 0 : index
    %c0_24 = arith.constant 0 : index
    %60 = vector.load %arg7[%c0_23, %c0_24] : memref<1x128xf32, #tpu.memory_space<vmem>>, vector<1x128xf32>
    %61 = vector.shape_cast %60 : vector<1x128xf32> to vector<128xf32>
    %c0_25 = arith.constant 0 : index
    %c0_26 = arith.constant 0 : index
    %62 = vector.load %arg8[%c0_25, %c0_26] : memref<1x128xf32, #tpu.memory_space<vmem>>, vector<1x128xf32>
    %63 = vector.shape_cast %62 : vector<1x128xf32> to vector<128xf32>
    %cst_27 = arith.constant dense<0.000000e+00> : vector<8xf32>
    %64 = vector.multi_reduction <add>, %59, %cst_27 [1] : vector<8x128xf32> to vector<8xf32>
    %65 = vector.shape_cast %64 : vector<8xf32> to vector<8x1xf32>
    %cst_28 = arith.constant 3.125000e-02 : f32
    %66 = vector.broadcast %cst_28 : f32 to vector<8x1xf32>
    %67 = arith.mulf %65, %66 : vector<8x1xf32>
    %68 = arith.mulf %59, %59 : vector<8x128xf32>
    %cst_29 = arith.constant dense<0.000000e+00> : vector<8xf32>
    %69 = vector.multi_reduction <add>, %68, %cst_29 [1] : vector<8x128xf32> to vector<8xf32>
    %70 = vector.shape_cast %69 : vector<8xf32> to vector<8x1xf32>
    %cst_30 = arith.constant 3.125000e-02 : f32
    %71 = vector.broadcast %cst_30 : f32 to vector<8x1xf32>
    %72 = arith.mulf %70, %71 : vector<8x1xf32>
    %73 = arith.mulf %67, %67 : vector<8x1xf32>
    %74 = arith.subf %72, %73 : vector<8x1xf32>
    %75 = vector.broadcast %67 : vector<8x1xf32> to vector<8x128xf32>
    %76 = arith.subf %59, %75 : vector<8x128xf32>
    %cst_31 = arith.constant 9.99999974E-6 : f32
    %77 = vector.broadcast %cst_31 : f32 to vector<8x1xf32>
    %78 = arith.addf %74, %77 : vector<8x1xf32>
    %79 = math.rsqrt %78 : vector<8x1xf32>
    %80 = vector.broadcast %79 : vector<8x1xf32> to vector<8x128xf32>
    %81 = arith.mulf %76, %80 : vector<8x128xf32>
    %82 = vector.shape_cast %61 : vector<128xf32> to vector<1x128xf32>
    %83 = vector.broadcast %82 : vector<1x128xf32> to vector<8x128xf32>
    %84 = arith.mulf %81, %83 : vector<8x128xf32>
    %85 = vector.shape_cast %63 : vector<128xf32> to vector<1x128xf32>
    %86 = vector.broadcast %85 : vector<1x128xf32> to vector<8x128xf32>
    %87 = arith.addf %84, %86 : vector<8x128xf32>
    %c0_32 = arith.constant 0 : index
    %c0_33 = arith.constant 0 : index
    %88 = vector.load %arg9[%c0_32, %c0_33] : memref<128x64xf32, #tpu.memory_space<vmem>>, vector<128x64xf32>
    %cst_34 = arith.constant dense<0.000000e+00> : vector<8x64xf32>
    %89 = tpu.matmul %87, %88, %cst_34 {dimension_numbers = #tpu.dot_dimension_numbers<[1], [0], [0], [1], [0, 0, 1, 1], [], []>} : vector<8x128xf32>, vector<128x64xf32>, vector<8x64xf32> -> vector<8x64xf32>
    %c0_35 = arith.constant 0 : index
    %c0_36 = arith.constant 0 : index
    %90 = vector.load %arg10[%c0_35, %c0_36] : memref<1x64xf32, #tpu.memory_space<vmem>>, vector<1x64xf32>
    %91 = vector.shape_cast %90 : vector<1x64xf32> to vector<64xf32>
    %92 = vector.shape_cast %91 : vector<64xf32> to vector<1x64xf32>
    %93 = vector.broadcast %92 : vector<1x64xf32> to vector<8x64xf32>
    %94 = arith.addf %89, %93 : vector<8x64xf32>
    %cst_37 = arith.constant 0.000000e+00 : f32
    %95 = vector.broadcast %cst_37 : f32 to vector<8x64xf32>
    %96 = arith.maximumf %94, %95 : vector<8x64xf32>
    %c0_38 = arith.constant 0 : index
    %c0_39 = arith.constant 0 : index
    %97 = vector.load %arg11[%c0_38, %c0_39] : memref<64x128xf32, #tpu.memory_space<vmem>>, vector<64x128xf32>
    %cst_40 = arith.constant dense<0.000000e+00> : vector<8x128xf32>
    %98 = tpu.matmul %96, %97, %cst_40 {dimension_numbers = #tpu.dot_dimension_numbers<[1], [0], [0], [1], [0, 0, 1, 1], [], []>} : vector<8x64xf32>, vector<64x128xf32>, vector<8x128xf32> -> vector<8x128xf32>
    %c0_41 = arith.constant 0 : index
    %c0_42 = arith.constant 0 : index
    %99 = vector.load %arg12[%c0_41, %c0_42] : memref<1x128xf32, #tpu.memory_space<vmem>>, vector<1x128xf32>
    %100 = vector.shape_cast %99 : vector<1x128xf32> to vector<128xf32>
    %101 = vector.shape_cast %100 : vector<128xf32> to vector<1x128xf32>
    %102 = vector.broadcast %101 : vector<1x128xf32> to vector<8x128xf32>
    %103 = arith.addf %98, %102 : vector<8x128xf32>
    %104 = arith.addf %103, %59 : vector<8x128xf32>
    %c0_43 = arith.constant 0 : index
    %c0_44 = arith.constant 0 : index
    %c0_45 = arith.constant 0 : index
    %105 = vector.load %arg13[%c0_43, %c0_44, %c0_45] : memref<1x8x128xf32, #tpu.memory_space<vmem>>, vector<1x8x128xf32>
    %106 = vector.shape_cast %105 : vector<1x8x128xf32> to vector<8x128xf32>
    %107 = vector.shape_cast %104 : vector<8x128xf32> to vector<1x8x128xf32>
    tpu.vector_store %arg13[%c0_43, %c0_44, %c0_45], %107 {strides = array<i32>} : memref<1x8x128xf32, #tpu.memory_space<vmem>>, vector<1x8x128xf32>,
    return
  }
  func.func @transform_0(%arg0: i32) -> (i32, i32, i32) {
    %c0_i32 = arith.constant 0 : i32
    %c0_i32_0 = arith.constant 0 : i32
    %c0_i32_1 = arith.constant 0 : i32
    return %arg0, %c0_i32, %c0_i32_0 : i32, i32, i32
  }
  func.func @transform_1(%arg0: i32) -> (i32, i32) {
    %c0_i32 = arith.constant 0 : i32
    %c0_i32_0 = arith.constant 0 : i32
    %c0_i32_1 = arith.constant 0 : i32
    return %c0_i32, %c0_i32_0 : i32, i32
  }
  func.func @transform_2(%arg0: i32) -> (i32, i32) {
    %c0_i32 = arith.constant 0 : i32
    %c0_i32_0 = arith.constant 0 : i32
    %c0_i32_1 = arith.constant 0 : i32
    return %c0_i32, %c0_i32_0 : i32, i32
  }
  func.func @transform_3(%arg0: i32) -> (i32, i32) {
    %c0_i32 = arith.constant 0 : i32
    %c0_i32_0 = arith.constant 0 : i32
    %c0_i32_1 = arith.constant 0 : i32
    return %c0_i32, %c0_i32_0 : i32, i32
  }
  func.func @transform_4(%arg0: i32) -> (i32, i32) {
    %c0_i32 = arith.constant 0 : i32
    %c0_i32_0 = arith.constant 0 : i32
    %c0_i32_1 = arith.constant 0 : i32
    return %c0_i32, %c0_i32_0 : i32, i32
  }
  func.func @transform_5(%arg0: i32) -> (i32, i32) {
    %c0_i32 = arith.constant 0 : i32
    %c0_i32_0 = arith.constant 0 : i32
    %c0_i32_1 = arith.constant 0 : i32
    return %c0_i32, %c0_i32_0 : i32, i32
  }
  func.func @transform_6(%arg0: i32) -> (i32, i32) {
    %c0_i32 = arith.constant 0 : i32
    %c0_i32_0 = arith.constant 0 : i32
    %c0_i32_1 = arith.constant 0 : i32
    return %c0_i32, %c0_i32_0 : i32, i32
  }
  func.func @transform_7(%arg0: i32) -> (i32, i32) {
    %c0_i32 = arith.constant 0 : i32
    %c0_i32_0 = arith.constant 0 : i32
    %c0_i32_1 = arith.constant 0 : i32
    return %c0_i32, %c0_i32_0 : i32, i32
  }
  func.func @transform_8(%arg0: i32) -> (i32, i32) {
    %c0_i32 = arith.constant 0 : i32
    %c0_i32_0 = arith.constant 0 : i32
    %c0_i32_1 = arith.constant 0 : i32
    return %c0_i32, %c0_i32_0 : i32, i32
  }
  func.func @transform_9(%arg0: i32) -> (i32, i32) {
    %c0_i32 = arith.constant 0 : i32
    %c0_i32_0 = arith.constant 0 : i32
    %c0_i32_1 = arith.constant 0 : i32
    return %c0_i32, %c0_i32_0 : i32, i32
  }
  func.func @transform_10(%arg0: i32) -> (i32, i32) {
    %c0_i32 = arith.constant 0 : i32
    %c0_i32_0 = arith.constant 0 : i32
    %c0_i32_1 = arith.constant 0 : i32
    return %c0_i32, %c0_i32_0 : i32, i32
  }
  func.func @transform_11(%arg0: i32) -> (i32, i32) {
    %c0_i32 = arith.constant 0 : i32
    %c0_i32_0 = arith.constant 0 : i32
    %c0_i32_1 = arith.constant 0 : i32
    return %c0_i32, %c0_i32_0 : i32, i32
  }
  func.func @transform_12(%arg0: i32) -> (i32, i32, i32) {
    %c0_i32 = arith.constant 0 : i32
    %c0_i32_0 = arith.constant 0 : i32
    %c0_i32_1 = arith.constant 0 : i32
    return %arg0, %c0_i32, %c0_i32_0 : i32, i32, i32
  }
}

</mosaic_0001>

<bundles_post_ra>
// kernel: tpu_custom_call.1
= control target key start
LH: loop header
LB: loop body
LE: loop exit
PB: predicated region body
PF: predicated region fallthrough
CT: control target
= control target key end

     0   :  { %17 = vsyncpa [#allocation3], 0  ;;  %s3164_s0 = inlined_call_operand.vmem [shape: f32[2,8,128], index: 0, kind: input, shape index: {}]   ;;  %s3165_s1 = inlined_call_operand.vmem [shape: f32[1,128], index: 1, kind: input, shape index: {}]   ;;  %s3166_s2 = inlined_call_operand.vmem [shape: f32[1,128], index: 2, kind: input, shape index: {}]   ;;  %s3167_s3 = inlined_call_operand.vmem [shape: f32[128,192], index: 3, kind: input, shape index: {}]   ;;  %s3168_s4 = inlined_call_operand.vmem [shape: f32[64,128], index: 4, kind: input, shape index: {}]   ;;  %s3169_s5 = inlined_call_operand.vmem [shape: f32[1,128], index: 5, kind: input, shape index: {}]   ;;  %s3170_s6 = inlined_call_operand.vmem [shape: f32[1,128], index: 6, kind: input, shape index: {}]   ;;  %s3171_s7 = inlined_call_operand.vmem [shape: f32[1,128], index: 7, kind: input, shape index: {}]   ;;  %s3172_s8 = inlined_call_operand.vmem [shape: f32[128,64], index: 8, kind: input, shape index: {}]   ;;  %s3173_s9 = inlined_call_operand.vmem [shape: f32[1,64], index: 9, kind: input, shape index: {}]   ;;  %s3174_s10 = inlined_call_operand.vmem [shape: f32[64,128], index: 10, kind: input, shape index: {}]   ;;  %s3175_s11 = inlined_call_operand.vmem [shape: f32[1,128], index: 11, kind: input, shape index: {}]   ;;  %s3176_s12 = inlined_call_operand.hbm [shape: f32[2,8,128], index: 12, kind: output, shape index: {}]  }
   0x1   :  { %19 = vsyncpa [#allocation3 + $0x1], 0  ;;  %s2657_s21 = smov 0   ;;  %s2659_s22 = smov 0  }
   0x2   :  { %s2661_s23 = smov 0   ;;  %s2663_s24 = smov 0  }
   0x3 LB: > { %3178 = sst [smem:[#allocation5_spill]] %s2573_s23  ;;  %s2678_s25 = sadd.s32 4294967295, %s2577_s24   ;;  %s2577_s24 = sphi %s2663_s24, %s3186_s24   ;;  %s2573_s23 = sphi %s2661_s23, %s3183_s23   ;;  %s2569_s22 = sphi %s2659_s22, %s3185_s22   ;;  %s2565_s21 = sphi %s2657_s21, %s3184_s21  }
   0x4   : > { %s2157_s26 = sadd.s32 4294967294, %s2577_s24   ;;  %s2682_s27 = sadd.s32 1, %s2577_s24  }
   0x5   : > { %s289_s28 = sadd.s32 1, %s2573_s23  ;;  %s286_s29 = ssub.s32 %s2577_s24, %s2682_s27 }
   0x6   : > { %p299_p0 = scmp.ne.s32.totalorder %s2573_s23, %s2569_s22  ;;  %p287_p1 = scmp.eq.s32.totalorder %s286_s29, 0 }
   0x7   : > { %p300_p2 = scmp.eq.s32.totalorder %s2678_s25, 1  ;;  %p305_p3 = scmp.ne.s32.totalorder %s2569_s22, %s2565_s21 }
   0x8   : > { %p306_p4 = scmp.eq.s32.totalorder %s2157_s26, 1  ;;  %p2160_p7 = scmp.ge.s32.totalorder %s2577_s24, 1 }
   0x9   : > { %s2693_s30 = scalar_select %p287_p1, %s2573_s23, %s289_s28  }
   0xa   : > { %p2695_p5 = por %p300_p2, %p299_p0  ;;  %p2699_p6 = por %p306_p4, %p305_p3 }
   0xb   : > { %3179 = sst [smem:[#allocation6_spill]] %s2693_s30  ;;  %p364_p8 = scmp.lt.s32.totalorder %s2577_s24, 3 }
   0xd   : > { %p365_p9 = pnand %p2160_p7, %p364_p8 }
   0xe   : > { %p405_p10 = scmp.lt.s32.totalorder (!%p365_p9), %s2678_s25, 1  ;;  %v440_v0 = vld [vmem:[%s3167_s3 + $0x8] sm:$0xff] (!%p365_p9)  ;;  %v442_v1 = vld [vmem:[%s3167_s3 + $0x18] sm:$0xff] (!%p365_p9)  ;;  %v439_v2 = vld [vmem:[%s3167_s3] sm:$0xff] (!%p365_p9)  ;;  %v2579_v39 = vmov (!%p365_p9), 0.0   ;;  %s2580_s30 = smov (!%p365_p9), 32  }
   0xf   : > { %368 = sbr.rel (%p365_p9) target bundleno = 2325 (0x915), region = 68  ;;  %v2364_v3 = vpack.c.bf16 (!%p365_p9), %v442_v1, %v440_v0  ;;  %v441_v4 = vld [vmem:[%s3167_s3 + $0x10] sm:$0xff] (!%p365_p9)  ;;  %v444_v5 = vld [vmem:[%s3167_s3 + $0x28] sm:$0xff] (!%p365_p9)  ;;  %v446_v6 = vld [vmem:[%s3167_s3 + $0x38] sm:$0xff] (!%p365_p9)  ;;  %535 = vmatprep.mubr.f32.mxu0 (!%p365_p9), %v2579_v39  ;;  %2251 = vmatprep.subr.mxu1 (!%p365_p9), %v2579_v39  ;;  %s2581_s26 = smov (!%p365_p9), 64   ;;  %vm2587_vm0 = vmmov (!%p365_p9), 0  }
  0x10   : > { %v2366_v7 = vpack.c.bf16 (!%p365_p9), %v441_v4, %v439_v2  ;;  %v2368_v8 = vpack.c.bf16 (!%p365_p9), %v446_v6, %v444_v5  ;;  %v443_v11 = vld [vmem:[%s3167_s3 + $0x20] sm:$0xff] (!%p365_p9)  ;;  %v445_v12 = vld [vmem:[%s3167_s3 + $0x30] sm:$0xff] (!%p365_p9)  ;;  %v448_v14 = vld [vmem:[%s3167_s3 + $0x48] sm:$0xff] (!%p365_p9)  ;;  %s2582_s28 = smov (!%p365_p9), 48   ;;  %s2583_s29 = smov (!%p365_p9), 16   ;;  %2253 = vmatprep.mubr.msk.f32.mxu1 (!%p365_p9), %vm2587_vm0, %v2579_v39  ;;  %v579_v5 = vlaneseq (!%p365_p9)  ;;  %vm982_vm1 = vcmask (!%p365_p9), 130048  }
  0x11   : > { %2365 = vmatprep.subr.bf16.mxu0 (!%p365_p9), %v2364_v3  ;;  %v2370_v13 = vpack.c.bf16 (!%p365_p9), %v445_v12, %v443_v11  ;;  %v450_v15 = vld [vmem:[%s3167_s3 + $0x58] sm:$0xff] (!%p365_p9)  ;;  %v447_v17 = vld [vmem:[%s3167_s3 + $0x40] sm:$0xff] (!%p365_p9)  ;;  %v449_v18 = vld [vmem:[%s3167_s3 + $0x50] sm:$0xff] (!%p365_p9)  ;;  %s2584_s15 = smov (!%p365_p9), 112   ;;  %v2588_v3 = vmov (!%p365_p9), 1983009808  }
  0x12   : > { %2367 = vmatpush1.bf16.msra.mxu0 (!%p365_p9), %v2366_v7  ;;  %v2372_v16 = vpack.c.bf16 (!%p365_p9), %v450_v15, %v448_v14  ;;  %v2374_v19 = vpack.c.bf16 (!%p365_p9), %v449_v18, %v447_v17  ;;  %v452_v20 = vld [vmem:[%s3167_s3 + $0x68] sm:$0xff] (!%p365_p9)  ;;  %v454_v21 = vld [vmem:[%s3167_s3 + $0x78] sm:$0xff] (!%p365_p9)  ;;  %v451_v23 = vld [vmem:[%s3167_s3 + $0x60] sm:$0xff] (!%p365_p9)  ;;  %v577_v4 = vunpack.c.l.s4 (!%p365_p9), %v2588_v3  ;;  %v2589_v7 = vmov (!%p365_p9), 1934713408   ;;  %s402_s18 = sand.u32 (!%p365_p9), 1, %s2569_s22  }
  0x13   : > { %2369 = vmatprep.subr.bf16.mxu0 (!%p365_p9), %v2368_v8  ;;  %v2376_v22 = vpack.c.bf16 (!%p365_p9), %v454_v21, %v452_v20  ;;  %v453_v24 = vld [vmem:[%s3167_s3 + $0x70] sm:$0xff] (!%p365_p9)  ;;  %v456_v26 = vld [vmem:[%s3167_s3 + $0x88] sm:$0xff] (!%p365_p9)  ;;  %v458_v27 = vld [vmem:[%s3167_s3 + $0x98] sm:$0xff] (!%p365_p9)  ;;  %v641_v8 = vunpack.c.l.s4 (!%p365_p9), %v2589_v7  ;;  %v580_v11 = vshrl.u32 (!%p365_p9), %v579_v5, 7  ;;  %vm1291_vm2 = vcmask (!%p365_p9), 64512  }
  0x14   : > { %v2378_v25 = vpack.c.bf16 (!%p365_p9), %v453_v24, %v451_v23  ;;  %v2380_v28 = vpack.c.bf16 (!%p365_p9), %v458_v27, %v456_v26  ;;  %v455_v29 = vld [vmem:[%s3167_s3 + $0x80] sm:$0xff] (!%p365_p9)  ;;  %v457_v30 = vld [vmem:[%s3167_s3 + $0x90] sm:$0xff] (!%p365_p9)  ;;  %v460_v32 = vld [vmem:[%s3167_s3 + $0xa8] sm:$0xff] (!%p365_p9)  ;;  %vm1777_vm3 = vcmask (!%p365_p9), 261120   ;;  %vm1779_vm4 = vcmask (!%p365_p9), 392192  }
  0x15   : > { %v2382_v31 = vpack.c.bf16 (!%p365_p9), %v457_v30, %v455_v29  ;;  %v462_v33 = vld [vmem:[%s3167_s3 + $0xb8] sm:$0xff] (!%p365_p9)  ;;  %v459_v34 = vld [vmem:[%s3167_s3 + $0xa0] sm:$0xff] (!%p365_p9)  ;;  %v461_v36 = vld [vmem:[%s3167_s3 + $0xb0] sm:$0xff] (!%p365_p9)  ;;  %v642_v14 = vunpack.c.0.s8 (!%p365_p9), %v641_v8  ;;  %vm1796_vm5 = vcmask (!%p365_p9), 523264  }
  0x16   : > { %s406_s16 = scalar_select %p405_p10, %s2678_s25, 1  ;;  %2371 = vmatpush1.bf16.msra.mxu0 %v2370_v13  ;;  %v2384_v35 = vpack.c.bf16 %v462_v33, %v460_v32  ;;  %v464_v37 = vld [vmem:[%s3167_s3 + $0xc8] sm:$0xff]  ;;  %v466_v38 = vld [vmem:[%s3167_s3 + $0xd8] sm:$0xff]  ;;  %v2386_v40 = vpack.c.bf16 %v461_v36, %v459_v34  ;;  %v463_v42 = vld [vmem:[%s3167_s3 + $0xc0] sm:$0xff] }
  0x17   : > { %2373 = vmatprep.subr.bf16.mxu0 %v2372_v16  ;;  %v2388_v41 = vpack.c.bf16 %v466_v38, %v464_v37  ;;  %v465_v43 = vld [vmem:[%s3167_s3 + $0xd0] sm:$0xff]  ;;  %v468_v44 = vld [vmem:[%s3167_s3 + $0xe8] sm:$0xff]  ;;  %v470_v45 = vld [vmem:[%s3167_s3 + $0xf8] sm:$0xff]  ;;  %v2843_v21 = vsub.s32 %v642_v14, %v580_v11 }
  0x18   : > { %s2162_s17 = sshll.u32 %s406_s16, 3  ;;  %v2390_v46 = vpack.c.bf16 %v465_v43, %v463_v42  ;;  %v2392_v47 = vpack.c.bf16 %v470_v45, %v468_v44  ;;  %v467_v48 = vld [vmem:[%s3167_s3 + $0xe0] sm:$0xff]  ;;  %v469_v49 = vld [vmem:[%s3167_s3 + $0xf0] sm:$0xff]  ;;  %s2585_s16 = smov 96  }
  0x19   : > { %s408_s20 = scalar_lea.vmem %s3164_s0, %s2162_s17  ;;  %v2394_v50 = vpack.c.bf16 %v469_v49, %v467_v48  ;;  %v2163_v60 = vld [vmem:[%s3165_s1] ss:$0 sm:$0xff]  ;;  %s2586_s17 = smov 80  }
  0x1a   : > { %v2728_v9 = vld [vmem:[%s408_s20] sm:$0xff]  ;;  %2375 = vmatpush1.bf16.msra.mxu0 %v2374_v19  ;;  %s2197_s20 = sshll.u32 %s2678_s25, 7  ;;  %s2591_s25 = smov [#allocation2]  }
  0x1b   : > { %412 = vadd.xlane.f32.xlu0 %v2728_v9  ;;  %v415_v10 = vmul.f32 %v2728_v9, %v2728_v9  ;;  %2377 = vmatprep.subr.bf16.mxu0 %v2376_v22  ;;  %v2164_v62 = vld [vmem:[%s3166_s2] ss:$0 sm:$0xff] }
  0x1e   : > { %2379 = vmatpush1.bf16.msra.mxu0 %v2378_v25 }
  0x1f   : > { %416 = vadd.xlane.f32.xlu0 %v415_v10  ;;  %2381 = vmatprep.subr.bf16.mxu0 %v2380_v28  ;;  %v578_v10 = vunpack.c.0.s8 %v577_v4 }
  0x21   : > { %v2841_v15 = vsub.s32 %v578_v10, %v580_v11 }
  0x22   : > { %2383 = vmatpush1.bf16.msra.mxu0 %v2382_v31 }
  0x23   : > { %2385 = vmatprep.subr.bf16.mxu0 %v2384_v35 }
  0x26   : > { %2387 = vmatpush1.bf16.msra.mxu0 %v2386_v40 }
  0x27   : > { %2389 = vmatprep.subr.bf16.mxu0 %v2388_v41 }
  0x2a   : > { %2391 = vmatpush1.bf16.msra.mxu0 %v2390_v46 }
  0x2b   : > { %2393 = vmatprep.subr.bf16.mxu0 %v2392_v47 }
  0x2e   : > { %2395 = vmatpush1.bf16.msra.mxu0 %v2394_v50 }
  0xa8   : > { %v413_v51 = vpop.xlane.xlu0 %412 }
  0xa9   : > { %v414_v52 = vmul.f32 0.03125, %v413_v51 }
  0xab   : > { %v419_v54 = vmul.f32 %v414_v52, %v414_v52  ;;  %v421_v58 = vsub.f32 %v2728_v9, %v414_v52 }
  0xac   : > { %v417_v53 = vpop.xlane.xlu0 %416 }
  0xad   : > { %v418_v55 = vmul.f32 0.03125, %v417_v53 }
  0xaf   : > { %v420_v56 = vsub.f32 %v418_v55, %v419_v54 }
  0xb1   : > { %v422_v57 = vadd.f32 1e-05, %v420_v56 }
  0xb3   : > { %2495 = vrsqrt.f32 %v422_v57 }
  0xbd   : > { %v2496_v59 = vpop.eup %2495 }
  0xbe   : > { %v424_v61 = vmul.f32 %v2496_v59, %v421_v58 }
  0xc0   : > { %v431_v63 = vmul.f32 %v2163_v60, %v424_v61 }
  0xc2   : > { %v438_v0 = vadd.f32 %v2164_v62, %v431_v63 }
  0xc4   : > { %536 = vmatmul.mubr.f32.vlgmr.msra.gmra.mrb[0].mxu0 %v438_v0 }
  0xc5   : > { %2307 = vmatprep.mubr.msk.f32.mxu0 %vm2587_vm0, %v2579_v39 }
 0x197   : > { %v2820_v1 = vpop.f32.mrb[0].mxu0 }
 0x198   : > { %558 = vrot.lane.b32.xlu0 %v2820_v1, %s2580_s30  ;;  %552 = vrot.lane.b32.xlu1 %v2820_v1, %s2581_s26  ;;  %v2825_v2 = vpop.f32.mrb[1].mxu0 }
 0x19c   : > { %555 = vrot.lane.b32.xlu1 %v2820_v1, %s2582_s28 }
 0x1a0   : > { %561 = vrot.lane.b32.xlu1 %v2820_v1, %s2583_s29 }
 0x1a4   : > { %543 = vrot.lane.b32.xlu1 %v2820_v1, %s2584_s15 }
 0x1a8   : > { %546 = vrot.lane.b32.xlu1 %v2820_v1, %s2585_s16 }
 0x1ac   : > { %549 = vrot.lane.b32.xlu1 %v2820_v1, %s2586_s17 }
 0x20a   : > { %v553_v6 = vpop.permute.xlu1 %552  ;;  %v559_v12 = vpop.permute.xlu0 %558 }
 0x20b   : > { %v606_v16 = vcombine.low %v553_v6, %v559_v12  ;;  %v607_v17 = vcombine.high %v553_v6, %v559_v12 }
 0x20d   : > { %v614_v22 = vrot.slane %v606_v16, %v2841_v15  ;;  %v621_v23 = vrot.slane %v607_v17, %v2841_v15 }
 0x20e   : > { %v556_v13 = vpop.permute.xlu1 %555 }
 0x212   : > { %v562_v18 = vpop.permute.xlu1 %561 }
 0x213   : > { %v622_v19 = vcombine.low %v556_v13, %v562_v18  ;;  %v623_v20 = vcombine.high %v556_v13, %v562_v18 }
 0x215   : > { %v630_v24 = vrot.slane %v622_v19, %v2841_v15  ;;  %v637_v25 = vrot.slane %v623_v20, %v2841_v15 }
 0x216   : > { %v544_v26 = vpop.permute.xlu1 %543 }
 0x217   : > { %v670_v27 = vcombine.low %v614_v22, %v630_v24  ;;  %v671_v28 = vcombine.high %v614_v22, %v630_v24  ;;  %v686_v29 = vcombine.low %v621_v23, %v637_v25  ;;  %v687_v30 = vcombine.high %v621_v23, %v637_v25 }
 0x219   : > { %v678_v31 = vrot.slane %v670_v27, %v2843_v21  ;;  %v685_v32 = vrot.slane %v671_v28, %v2843_v21  ;;  %v694_v33 = vrot.slane %v686_v29, %v2843_v21  ;;  %v701_v34 = vrot.slane %v687_v30, %v2843_v21 }
 0x21a   : > { %v547_v35 = vpop.permute.xlu1 %546 }
 0x21b   : > { %v2166_v36 = vcombine.low %v678_v31, %v685_v32  ;;  %v2168_v37 = vcombine.high %v678_v31, %v685_v32  ;;  %v2170_v38 = vcombine.low %v694_v33, %v701_v34  ;;  %v2172_v40 = vcombine.high %v694_v33, %v701_v34 }
 0x21c   : > { %v574_v41 = vcombine.low %v2820_v1, %v547_v35  ;;  %v575_v42 = vcombine.high %v2820_v1, %v547_v35 }
 0x21d   : > { %v793_v43 = vrot.slane %v2166_v36, %v2841_v15  ;;  %v809_v44 = vrot.slane %v2168_v37, %v2841_v15  ;;  %v825_v45 = vrot.slane %v2170_v38, %v2841_v15  ;;  %v841_v46 = vrot.slane %v2172_v40, %v2841_v15 }
 0x21e   : > { %v550_v47 = vpop.permute.xlu1 %549  ;;  %v582_v51 = vrot.slane %v574_v41, %v2841_v15  ;;  %v589_v53 = vrot.slane %v575_v42, %v2841_v15 }
 0x21f   : > { %v590_v48 = vcombine.low %v544_v26, %v550_v47  ;;  %v591_v49 = vcombine.high %v544_v26, %v550_v47  ;;  %v858_v50 = vcombine.low %v793_v43, %v809_v44  ;;  %v890_v52 = vcombine.low %v825_v45, %v841_v46 }
 0x220   : > { %v859_v16 = vcombine.high %v793_v43, %v809_v44  ;;  %v891_v17 = vcombine.high %v825_v45, %v841_v46 }
 0x221   : > { %v598_v54 = vrot.slane %v590_v48, %v2841_v15  ;;  %v605_v55 = vrot.slane %v591_v49, %v2841_v15  ;;  %v866_v56 = vrot.slane %v858_v50, %v2843_v21  ;;  %v898_v57 = vrot.slane %v890_v52, %v2843_v21 }
 0x222   : > { %v873_v25 = vrot.slane %v859_v16, %v2843_v21  ;;  %v905_v26 = vrot.slane %v891_v17, %v2843_v21 }
 0x223   : > { %v638_v58 = vcombine.low %v582_v51, %v598_v54  ;;  %v639_v59 = vcombine.high %v582_v51, %v598_v54  ;;  %v654_v60 = vcombine.low %v589_v53, %v605_v55  ;;  %v655_v61 = vcombine.high %v589_v53, %v605_v55 }
 0x224   : > { %v910_v62 = vcombine.low %v866_v56, %v898_v57  ;;  %v911_v24 = vcombine.high %v866_v56, %v898_v57  ;;  %v912_v30 = vcombine.low %v873_v25, %v905_v26  ;;  %v913_v32 = vcombine.high %v873_v25, %v905_v26 }
 0x225   : > { %v646_v63 = vrot.slane %v638_v58, %v2843_v21  ;;  %v653_v0 = vrot.slane %v639_v59, %v2843_v21  ;;  %v662_v1 = vrot.slane %v654_v60, %v2843_v21  ;;  %v669_v3 = vrot.slane %v655_v61, %v2843_v21 }
 0x226   : > { %2252 = vmatpush3.xpose.msk.msra.mxu1 %vm982_vm1, %v910_v62 }
 0x227   : > { %v2165_v4 = vcombine.low %v646_v63, %v653_v0  ;;  %v2167_v5 = vcombine.high %v646_v63, %v653_v0  ;;  %v2169_v6 = vcombine.low %v662_v1, %v669_v3  ;;  %v2171_v7 = vcombine.high %v662_v1, %v669_v3  ;;  %2256 = vmatprep.subr.mxu1 %v2579_v39 }
 0x229   : > { %v786_v8 = vrot.slane %v2165_v4, %v2841_v15  ;;  %v802_v10 = vrot.slane %v2167_v5, %v2841_v15  ;;  %v818_v11 = vrot.slane %v2169_v6, %v2841_v15  ;;  %v834_v12 = vrot.slane %v2171_v7, %v2841_v15 }
 0x22b   : > { %v842_v13 = vcombine.low %v786_v8, %v802_v10  ;;  %v874_v14 = vcombine.low %v818_v11, %v834_v12  ;;  %v843_v20 = vcombine.high %v786_v8, %v802_v10  ;;  %v875_v22 = vcombine.high %v818_v11, %v834_v12 }
 0x22d   : > { %v850_v18 = vrot.slane %v842_v13, %v2843_v21  ;;  %v882_v19 = vrot.slane %v874_v14, %v2843_v21  ;;  %v857_v28 = vrot.slane %v843_v20, %v2843_v21  ;;  %v889_v29 = vrot.slane %v875_v22, %v2843_v21 }
 0x22f   : > { %v906_v23 = vcombine.low %v850_v18, %v882_v19  ;;  %v907_v27 = vcombine.high %v850_v18, %v882_v19  ;;  %v908_v31 = vcombine.low %v857_v28, %v889_v29  ;;  %v909_v33 = vcombine.high %v857_v28, %v889_v29 }
 0x231   : > { %2254 = vmatmul.mubr.msk.f32.vlgmr.msra.gmra.mrb[0].mxu1 %vm982_vm1, %v906_v23 }
 0x232   : > { %2257 = vmatpush3.xpose.msk.msra.mxu1 %vm982_vm1, %v911_v24  ;;  %2258 = vmatprep.mubr.msk.f32.mxu1 %vm2587_vm0, %v2579_v39 }
 0x233   : > { %2261 = vmatprep.subr.mxu1 %v2579_v39 }
 0x235   : > { %2259 = vmatmul.mubr.msk.f32.vlgmr.msra.gmra.mrb[2].mxu1 %vm982_vm1, %v907_v27 }
 0x236   : > { %2262 = vmatpush3.xpose.msk.msra.mxu1 %vm982_vm1, %v912_v30  ;;  %2263 = vmatprep.mubr.msk.f32.mxu1 %vm2587_vm0, %v2579_v39 }
 0x237   : > { %2266 = vmatprep.subr.mxu1 %v2579_v39 }
 0x239   : > { %2264 = vmatmul.mubr.msk.f32.vlgmr.msra.gmra.mrb[4].mxu1 %vm982_vm1, %v908_v31 }
 0x23a   : > { %2267 = vmatpush3.xpose.msk.msra.mxu1 %vm982_vm1, %v913_v32  ;;  %2268 = vmatprep.mubr.msk.f32.mxu1 %vm2587_vm0, %v2579_v39 }
 0x23b   : > { %2271 = vmatprep.subr.mxu1 %v2579_v39 }
 0x23d   : > { %2269 = vmatmul.mubr.msk.f32.vlgmr.msra.gmra.mrb[6].mxu1 %vm982_vm1, %v909_v33 }
 0x23e   : > { %2273 = vmatprep.mubr.msk.f32.mxu1 %vm2587_vm0, %v2579_v39 }
 0x304   : > { %v1055_v34 = vpop.f32.mrb[0].mxu1 }
 0x305   : > { %v1287_v35 = vmul.f32 0.25, %v1055_v34  ;;  %v2255_v36 = vpop.f32.mrb[1].mxu1 }
 0x307   : > { %v1292_v37 = vsel %vm1291_vm2, %v1287_v35, -inf }
 0x308   : > { %1293 = vmax.xlane.f32.xlu1 %v1292_v37  ;;  %v1131_v38 = vpop.f32.mrb[2].mxu1 }
 0x309   : > { %v1288_v40 = vmul.f32 0.25, %v1131_v38  ;;  %v2260_v41 = vpop.f32.mrb[3].mxu1 }
 0x30b   : > { %v1295_v42 = vsel %vm1291_vm2, %v1288_v40, -inf }
 0x30c   : > { %1296 = vmax.xlane.f32.xlu0 %v1295_v42  ;;  %v1207_v43 = vpop.f32.mrb[4].mxu1 }
 0x30d   : > { %v1289_v44 = vmul.f32 0.25, %v1207_v43  ;;  %v2265_v45 = vpop.f32.mrb[5].mxu1 }
 0x30f   : > { %v1298_v46 = vsel %vm1291_vm2, %v1289_v44, -inf }
 0x310   : > { %1299 = vmax.xlane.f32.xlu1 %v1298_v46  ;;  %v1283_v47 = vpop.f32.mrb[6].mxu1 }
 0x311   : > { %v1290_v48 = vmul.f32 0.25, %v1283_v47  ;;  %v2270_v49 = vpop.f32.mrb[7].mxu1 }
 0x313   : > { %v1301_v50 = vsel %vm1291_vm2, %v1290_v48, -inf }
 0x314   : > { %1302 = vmax.xlane.f32.xlu0 %v1301_v50 }
 0x321   : > { %565 = vrot.lane.b32.xlu1 %v2825_v2, %s2584_s15 }
 0x395   : > { %v1294_v51 = vpop.xlane.xlu1 %1293 }
 0x396   : > { %v1304_v52 = vsub.f32 %v1287_v35, %v1294_v51 }
 0x398   : > { %v1308_v53 = vmul.f32 1.442695, %v1304_v52 }
 0x399   : > { %v1297_v54 = vpop.xlane.xlu0 %1296 }
 0x39a   : > { %2497 = vpow2.f32 %v1308_v53  ;;  %v1305_v55 = vsub.f32 %v1288_v40, %v1297_v54 }
 0x39c   : > { %v1310_v56 = vmul.f32 1.442695, %v1305_v55 }
 0x39d   : > { %v1300_v61 = vpop.xlane.xlu1 %1299 }
 0x39e   : > { %2499 = vpow2.f32 %v1310_v56  ;;  %v1306_v62 = vsub.f32 %v1289_v44, %v1300_v61 }
 0x3a0   : > { %v1312_v0 = vmul.f32 1.442695, %v1306_v62  ;;  %v1781_v62 = vld [vmem:[%s3168_s4] sm:$0xff] }
 0x3a1   : > { %v1303_v63 = vpop.xlane.xlu0 %1302  ;;  %v566_v8 = vpop.permute.xlu1 %565 }
 0x3a2   : > { %v1307_v1 = vsub.f32 %v1290_v48, %v1303_v63  ;;  %2501 = vpow2.f32 %v1312_v0  ;;  %v1782_v63 = vld [vmem:[%s3168_s4 + $0x8] sm:$0xff]  ;;  %v1783_v0 = vld [vmem:[%s3168_s4 + $0x10] sm:$0xff] }
 0x3a4   : > { %v2498_v57 = vpop.eup %2497  ;;  %v1314_v3 = vmul.f32 1.442695, %v1307_v1  ;;  %v2590_v1 = vmov 0.0|0.0  }
 0x3a5   : > { %v1316_v58 = vsel %vm1291_vm2, %v2498_v57, 0.0  ;;  %2396 = vmatprep.subr.bf16.mxu0 %v2590_v1 }
 0x3a6   : > { %1317 = vadd.xlane.f32.xlu1 %v1316_v58  ;;  %2503 = vpow2.f32 %v1314_v3  ;;  %v2397_v3 = vpack.c.bf16 %v1782_v63, %v1781_v62  ;;  %v1900_v63 = vld [vmem:[%s3172_s8] sm:$0xff] }
 0x3a8   : > { %v2906_v59 = vpop.eup %2499  ;;  %2398 = vmatpush3.bf16.msra.mxu0 %v2397_v3  ;;  %v1902_v3 = vld [vmem:[%s3172_s8 + $0x10] sm:$0xff] }
 0x3a9   : > { %v1319_v60 = vsel %vm1291_vm2, %v2906_v59, 0.0  ;;  %2399 = vmatprep.subr.bf16.mxu0 %v2590_v1 }
 0x3aa   : > { %1320 = vadd.xlane.f32.xlu0 %v1319_v60 }
 0x3ac   : > { %v2914_v4 = vpop.eup %2501 }
 0x3ad   : > { %v1322_v5 = vsel %vm1291_vm2, %v2914_v4, 0.0 }
 0x3b0   : > { %v2918_v6 = vpop.eup %2503 }
 0x3b1   : > { %v1325_v7 = vsel %vm1291_vm2, %v2918_v6, 0.0 }
 0x3b7   : > { %571 = vrot.lane.b32.xlu1 %v2825_v2, %s2586_s17  ;;  %s3122_s17 = scalar_lea.hbm %s3176_s12, %s2197_s20 }
 0x3c0   : > { %568 = vrot.lane.b32.xlu0 %v2825_v2, %s2585_s16 }
 0x3db   : > { %1323 = vadd.xlane.f32.xlu1 %v1322_v5 }
 0x3df   : > { %1326 = vadd.xlane.f32.xlu0 %v1325_v7  ;;  %v1786_v7 = vld [vmem:[%s3168_s4 + $0x28] sm:$0xff] }
 0x433   : > { %v1318_v10 = vpop.xlane.xlu1 %1317 }
 0x434   : > { %2505 = vrcp.f32 %v1318_v10 }
 0x437   : > { %v1321_v11 = vpop.xlane.xlu0 %1320  ;;  %v572_v12 = vpop.permute.xlu1 %571 }
 0x438   : > { %v726_v13 = vcombine.low %v566_v8, %v572_v12  ;;  %v727_v14 = vcombine.high %v566_v8, %v572_v12  ;;  %2507 = vrcp.f32 %v1321_v11 }
 0x43a   : > { %v734_v19 = vrot.slane %v726_v13, %v2841_v15  ;;  %v741_v20 = vrot.slane %v727_v14, %v2841_v15 }
 0x43b   : > { %v569_v16 = vpop.permute.xlu0 %568 }
 0x43c   : > { %v710_v17 = vcombine.low %v2825_v2, %v569_v16  ;;  %v711_v18 = vcombine.high %v2825_v2, %v569_v16 }
 0x43e   : > { %v718_v22 = vrot.slane %v710_v17, %v2841_v15  ;;  %v725_v23 = vrot.slane %v711_v18, %v2841_v15  ;;  %v2506_v42 = vpop.eup %2505 }
 0x43f   : > { %v1329_v49 = vmul.f32 %v2506_v42, %v2498_v57 }
 0x440   : > { %v742_v24 = vcombine.low %v718_v22, %v734_v19  ;;  %v743_v25 = vcombine.high %v718_v22, %v734_v19  ;;  %v758_v26 = vcombine.low %v725_v23, %v741_v20  ;;  %v759_v27 = vcombine.high %v725_v23, %v741_v20 }
 0x442   : > { %v750_v28 = vrot.slane %v742_v24, %v2843_v21  ;;  %v757_v29 = vrot.slane %v743_v25, %v2843_v21  ;;  %v766_v30 = vrot.slane %v758_v26, %v2843_v21  ;;  %v773_v2 = vrot.slane %v759_v27, %v2843_v21  ;;  %v2508_v48 = vpop.eup %2507 }
 0x443   : > { %v1331_v53 = vmul.f32 %v2508_v48, %v2906_v59 }
 0x444   : > { %v914_v31 = vcombine.low %v750_v28, %v757_v29  ;;  %v2173_v32 = vcombine.high %v750_v28, %v757_v29  ;;  %v930_v33 = vcombine.low %v766_v30, %v773_v2  ;;  %v2174_v34 = vcombine.high %v766_v30, %v773_v2 }
 0x446   : > { %v921_v35 = vrot.slane %v914_v31, %v2841_v15  ;;  %v929_v36 = vrot.slane %v2173_v32, %v2841_v15  ;;  %v937_v37 = vrot.slane %v930_v33, %v2841_v15  ;;  %v945_v38 = vrot.slane %v2174_v34, %v2841_v15  ;;  %v1787_v31 = vld [vmem:[%s3168_s4 + $0x30] sm:$0xff]  ;;  %v1788_v32 = vld [vmem:[%s3168_s4 + $0x38] sm:$0xff] }
 0x448   : > { %v946_v40 = vcombine.low %v921_v35, %v929_v36  ;;  %v962_v41 = vcombine.low %v937_v37, %v945_v38  ;;  %v947_v45 = vcombine.high %v921_v35, %v929_v36  ;;  %v963_v46 = vcombine.high %v937_v37, %v945_v38 }
 0x449   : > { %v2406_v37 = vpack.c.bf16 %v1788_v32, %v1787_v31  ;;  %v1994_v31 = vld [vmem:[%s3174_s10] sm:$0xff]  ;;  %v1995_v32 = vld [vmem:[%s3174_s10 + $0x8] sm:$0xff] }
 0x44a   : > { %v954_v43 = vrot.slane %v946_v40, %v2843_v21  ;;  %v970_v44 = vrot.slane %v962_v41, %v2843_v21  ;;  %v961_v51 = vrot.slane %v947_v45, %v2843_v21  ;;  %v977_v52 = vrot.slane %v963_v46, %v2843_v21 }
 0x44c   : > { %v978_v47 = vcombine.low %v954_v43, %v970_v44  ;;  %v979_v50 = vcombine.high %v954_v43, %v970_v44  ;;  %v980_v54 = vcombine.low %v961_v51, %v977_v52  ;;  %v981_v60 = vcombine.high %v961_v51, %v977_v52 }
 0x44e   : > { %2272 = vmatpush3.msra.mxu1 %v978_v47 }
 0x44f   : > { %2274 = vmatmul.mubr.msk.f32.vlgmr.msra.gmra.mrb[8].mxu1 %vm1291_vm2, %v1329_v49  ;;  %2276 = vmatprep.subr.mxu1 %v2579_v39 }
 0x450   : > { %2277 = vmatpush3.msra.mxu1 %v979_v50  ;;  %2278 = vmatprep.mubr.msk.f32.mxu1 %vm2587_vm0, %v2579_v39 }
 0x451   : > { %2281 = vmatprep.subr.mxu1 %v2579_v39 }
 0x453   : > { %2279 = vmatmul.mubr.msk.f32.vlgmr.msra.gmra.mrb[10].mxu1 %vm1291_vm2, %v1331_v53 }
 0x454   : > { %2282 = vmatpush3.msra.mxu1 %v980_v54  ;;  %2283 = vmatprep.mubr.msk.f32.mxu1 %vm2587_vm0, %v2579_v39 }
 0x455   : > { %2286 = vmatprep.subr.mxu1 %v2579_v39 }
 0x468   : > { %v1324_v55 = vpop.xlane.xlu1 %1323 }
 0x469   : > { %2509 = vrcp.f32 %v1324_v55 }
 0x46c   : > { %v1327_v56 = vpop.xlane.xlu0 %1326 }
 0x46d   : > { %2511 = vrcp.f32 %v1327_v56 }
 0x473   : > { %v2510_v57 = vpop.eup %2509 }
 0x474   : > { %v1333_v58 = vmul.f32 %v2510_v57, %v2914_v4  ;;  %v1784_v4 = vld [vmem:[%s3168_s4 + $0x18] sm:$0xff] }
 0x475   : > { %v2400_v5 = vpack.c.bf16 %v1784_v4, %v1783_v0  ;;  %v1901_v0 = vld [vmem:[%s3172_s8 + $0x8] sm:$0xff] }
 0x476   : > { %2284 = vmatmul.mubr.msk.f32.vlgmr.msra.gmra.mrb[12].mxu1 %vm1291_vm2, %v1333_v58  ;;  %v2409_v4 = vpack.c.bf16 %v1901_v0, %v1900_v63 }
 0x477   : > { %v2512_v59 = vpop.eup %2511  ;;  %2287 = vmatpush3.msra.mxu1 %v981_v60  ;;  %2288 = vmatprep.mubr.msk.f32.mxu1 %vm2587_vm0, %v2579_v39 }
 0x478   : > { %v1335_v61 = vmul.f32 %v2512_v59, %v2918_v6  ;;  %2408 = vmatprep.subr.bf16.mxu1 %v2590_v1  ;;  %v1785_v6 = vld [vmem:[%s3168_s4 + $0x20] sm:$0xff]  ;;  %2401 = vmatpush3.bf16.msra.mxu0 %v2400_v5  ;;  %v1903_v5 = vld [vmem:[%s3172_s8 + $0x18] sm:$0xff] }
 0x479   : > { %v2403_v8 = vpack.c.bf16 %v1786_v7, %v1785_v6  ;;  %2402 = vmatprep.subr.bf16.mxu0 %v2590_v1  ;;  %v2412_v6 = vpack.c.bf16 %v1903_v5, %v1902_v3 }
 0x47a   : > { %2289 = vmatmul.mubr.msk.f32.vlgmr.msra.gmra.mrb[14].mxu1 %vm1291_vm2, %v1335_v61 }
 0x47b   : > { %2342 = vmatprep.mubr.msk.f32.mxu1 %vm2587_vm0, %v2579_v39  ;;  %2410 = vmatpush3.bf16.msra.mxu1 %v2409_v4 }
 0x47c   : > { %2404 = vmatpush3.bf16.msra.mxu0 %v2403_v8  ;;  %2411 = vmatprep.subr.bf16.mxu1 %v2590_v1 }
 0x47d   : > { %2405 = vmatprep.subr.bf16.mxu0 %v2590_v1 }
 0x47f   : > { %2413 = vmatpush3.bf16.msra.mxu1 %v2412_v6 }
 0x480   : > { %2407 = vmatpush3.bf16.msra.mxu0 %v2406_v37  ;;  %2414 = vmatprep.subr.bf16.mxu1 %v2590_v1  ;;  %v1998_v37 = vld [vmem:[%s3174_s10 + $0x20] sm:$0xff] }
 0x481   : > { %2432 = vmatprep.subr.bf16.mxu0 %v2590_v1 }
 0x522   : > { %v1405_v10 = vpop.f32.mrb[8].mxu1 }
 0x523   : > { %v2275_v11 = vpop.f32.mrb[9].mxu1 }
 0x526   : > { %v1478_v12 = vpop.f32.mrb[10].mxu1 }
 0x527   : > { %v2280_v13 = vpop.f32.mrb[11].mxu1 }
 0x528   : > { %v1904_v13 = vld [vmem:[%s3172_s8 + $0x20] sm:$0xff] }
 0x549   : > { %v1551_v14 = vpop.f32.mrb[12].mxu1 }
 0x54a   : > { %v1628_v16 = vcombine.low %v1405_v10, %v1551_v14  ;;  %v1629_v17 = vcombine.high %v1405_v10, %v1551_v14  ;;  %v2285_v18 = vpop.f32.mrb[13].mxu1  ;;  %v1905_v14 = vld [vmem:[%s3172_s8 + $0x28] sm:$0xff] }
 0x54c   : > { %v1636_v24 = vrot.slane %v1628_v16, %v2841_v15  ;;  %v1643_v25 = vrot.slane %v1629_v17, %v2841_v15  ;;  %v2415_v16 = vpack.c.bf16 %v1905_v14, %v1904_v13  ;;  %v1907_v17 = vld [vmem:[%s3172_s8 + $0x38] sm:$0xff] }
 0x54d   : > { %v1624_v19 = vpop.f32.mrb[14].mxu1 }
 0x54e   : > { %v1644_v20 = vcombine.low %v1478_v12, %v1624_v19  ;;  %v1645_v22 = vcombine.high %v1478_v12, %v1624_v19  ;;  %v2290_v23 = vpop.f32.mrb[15].mxu1  ;;  %2416 = vmatpush3.bf16.msra.mxu1 %v2415_v16  ;;  %v1908_v19 = vld [vmem:[%s3172_s8 + $0x40] sm:$0xff] }
 0x54f   : > { %2417 = vmatprep.subr.bf16.mxu1 %v2590_v1 }
 0x550   : > { %v1652_v26 = vrot.slane %v1644_v20, %v2841_v15  ;;  %v1659_v27 = vrot.slane %v1645_v22, %v2841_v15  ;;  %v1909_v20 = vld [vmem:[%s3172_s8 + $0x48] sm:$0xff]  ;;  %v1910_v22 = vld [vmem:[%s3172_s8 + $0x50] sm:$0xff] }
 0x551   : > { %v2421_v23 = vpack.c.bf16 %v1909_v20, %v1908_v19 }
 0x552   : > { %v1660_v28 = vcombine.low %v1636_v24, %v1652_v26  ;;  %v1661_v29 = vcombine.high %v1636_v24, %v1652_v26  ;;  %v1676_v30 = vcombine.low %v1643_v25, %v1659_v27  ;;  %v1677_v2 = vcombine.high %v1643_v25, %v1659_v27  ;;  %v1911_v24 = vld [vmem:[%s3172_s8 + $0x58] sm:$0xff]  ;;  %v1912_v26 = vld [vmem:[%s3172_s8 + $0x60] sm:$0xff]  ;;  %v1913_v27 = vld [vmem:[%s3172_s8 + $0x68] sm:$0xff] }
 0x553   : > { %v2424_v25 = vpack.c.bf16 %v1911_v24, %v1910_v22 }
 0x554   : > { %v1668_v33 = vrot.slane %v1660_v28, %v2843_v21  ;;  %v1675_v34 = vrot.slane %v1661_v29, %v2843_v21  ;;  %v1684_v35 = vrot.slane %v1676_v30, %v2843_v21  ;;  %v1691_v36 = vrot.slane %v1677_v2, %v2843_v21  ;;  %v1914_v29 = vld [vmem:[%s3172_s8 + $0x70] sm:$0xff]  ;;  %v1915_v30 = vld [vmem:[%s3172_s8 + $0x78] sm:$0xff] }
 0x555   : > { %v2427_v28 = vpack.c.bf16 %v1913_v27, %v1912_v26  ;;  %v2430_v2 = vpack.c.bf16 %v1915_v30, %v1914_v29 }
 0x556   : > { %v1696_v38 = vcombine.low %v1668_v33, %v1675_v34  ;;  %v2187_v40 = vcombine.high %v1668_v33, %v1675_v34  ;;  %v1712_v41 = vcombine.low %v1684_v35, %v1691_v36  ;;  %v2188_v42 = vcombine.high %v1684_v35, %v1691_v36  ;;  %v1996_v33 = vld [vmem:[%s3174_s10 + $0x10] sm:$0xff]  ;;  %v1997_v35 = vld [vmem:[%s3174_s10 + $0x18] sm:$0xff] }
 0x557   : > { %v2433_v34 = vpack.c.bf16 %v1995_v32, %v1994_v31  ;;  %v2436_v36 = vpack.c.bf16 %v1997_v35, %v1996_v33 }
 0x558   : > { %v1703_v43 = vrot.slane %v1696_v38, %v2841_v15  ;;  %v1711_v44 = vrot.slane %v2187_v40, %v2841_v15  ;;  %v1719_v45 = vrot.slane %v1712_v41, %v2841_v15  ;;  %v1727_v46 = vrot.slane %v2188_v42, %v2841_v15  ;;  %v1999_v38 = vld [vmem:[%s3174_s10 + $0x28] sm:$0xff] }
 0x559   : > { %v2439_v40 = vpack.c.bf16 %v1999_v38, %v1998_v37 }
 0x55a   : > { %v1729_v47 = vcombine.high %v1703_v43, %v1711_v44  ;;  %v1745_v48 = vcombine.high %v1719_v45, %v1727_v46  ;;  %v1728_v49 = vcombine.low %v1703_v43, %v1711_v44  ;;  %v1744_v50 = vcombine.low %v1719_v45, %v1727_v46 }
 0x55c   : > { %v1743_v51 = vrot.slane %v1729_v47, %v2843_v21  ;;  %v1759_v52 = vrot.slane %v1745_v48, %v2843_v21  ;;  %v1736_v53 = vrot.slane %v1728_v49, %v2843_v21  ;;  %v1752_v54 = vrot.slane %v1744_v50, %v2843_v21  ;;  %v2191_v50 = vld [vmem:[%s3170_s6] ss:$0 sm:$0xff] }
 0x55e   : > { %v1762_v55 = vcombine.low %v1743_v51, %v1759_v52  ;;  %v1761_v56 = vcombine.high %v1736_v53, %v1752_v54  ;;  %v1763_v57 = vcombine.high %v1743_v51, %v1759_v52  ;;  %v1760_v58 = vcombine.low %v1736_v53, %v1752_v54  ;;  %v2000_v54 = vld [vmem:[%s3174_s10 + $0x30] sm:$0xff] }
 0x560   : > { %1769 = vrot.lane.b32.xlu1 %v1762_v55, %s2580_s30  ;;  %1765 = vrot.lane.b32.xlu0 %v1761_v56, %s2583_s29  ;;  %v2001_v55 = vld [vmem:[%s3174_s10 + $0x38] sm:$0xff]  ;;  %s2085_s30 = scalar_lea.sflag [#allocation3], %s402_s18 }
 0x561   : > { %v2442_v56 = vpack.c.bf16 %v2001_v55, %v2000_v54 }
 0x564   : > { %1773 = vrot.lane.b32.xlu1 %v1763_v57, %s2582_s28  ;;  %v2193_v57 = vld [vmem:[%s3173_s9] ss:$0 sm:$0xff]  ;;  %s2161_s28 = sshll.u32 %s402_s18, 3 }
 0x565   : > { %s404_s23 = scalar_lea.vmem [#allocation2], %s2161_s28  ;;  %s2519_s28 = sshll.u32 %s2591_s25, 4  ;;  %s2520_s28 = int_to_ptr.vmem [resolvable:$false] %s2519_s28 }
 0x566   : > { %s2098_s26 = sshll.u32 %s404_s23, 4  ;;  %s2521_s19 = scalar_lea.vmem %s2520_s28, 256  ;;  %s3124_s26 = int_to_ptr.vmem [resolvable:$true] %s2098_s26 }
 0x567   : > { %s2515_s29 = scalar_lea.vmem %s3124_s26, 128  ;;  %p2522_p0 = scmp.lt.s32.totalorder %s3124_s26, %s2520_s28 }
 0x568   : > { %p2516_p11 = scmp.ne.s32.totalorder %s3124_s26, %s2515_s29  ;;  %p2523_p1 = scmp.lt.s32.totalorder %s2521_s19, %s2515_s29 }
 0x56a   : > { %p2517_p12 = pnand %p2516_p11, %p2695_p5  ;;  %p2524_p2 = por %p2523_p1, %p2522_p0 }
 0x56c   : > { %p2518_p13 = pneg %p2517_p12 }
 0x56e   : > { %p2525_p3 = pnand %p2524_p2, %p2518_p13 }
 0x5d2   : > { %v1770_v15 = vpop.permute.xlu1 %1769  ;;  %v1766_v60 = vpop.permute.xlu0 %1765 }
 0x5d3   : > { %v1776_v59 = vsel %vm982_vm1, %v1760_v58, %v1766_v60 }
 0x5d4   : > { %v1778_v62 = vsel %vm1777_vm3, %v1776_v59, %v1770_v15 }
 0x5d6   : > { %v1774_v61 = vpop.permute.xlu1 %1773 }
 0x5d7   : > { %v1780_v21 = vsel %vm1779_vm4, %v1778_v62, %v1774_v61  ;;  %v2194_v61 = vld [vmem:[%s3175_s11] ss:$0 sm:$0xff] }
 0x5d8   : > { %2308 = vmatmul.mubr.msk.f32.vlgmr.msra.gmra.mrb[2].mxu0 %vm1796_vm5, %v1780_v21 }
 0x5d9   : > { %2361 = vmatprep.mubr.msk.f32.mxu0 %vm2587_vm0, %v2579_v39  ;;  %v2189_v39 = vld [vmem:[%s3169_s5] ss:$0 sm:$0xff]  ;;  %2434 = vmatpush3.bf16.msra.mxu0 %v2433_v34 }
 0x5da   : > { %2435 = vmatprep.subr.bf16.mxu0 %v2590_v1 }
 0x5dd   : > { %2437 = vmatpush3.bf16.msra.mxu0 %v2436_v36 }
 0x5de   : > { %2438 = vmatprep.subr.bf16.mxu0 %v2590_v1 }
 0x5e1   : > { %2440 = vmatpush3.bf16.msra.mxu0 %v2439_v40 }
 0x5e2   : > { %2441 = vmatprep.subr.bf16.mxu0 %v2590_v1 }
 0x5e5   : > { %2443 = vmatpush3.bf16.msra.mxu0 %v2442_v56 }
 0x6ab   : > { %v1866_v7 = vpop.f32.mrb[2].mxu0 }
 0x6ac   : > { %v1867_v8 = vadd.f32 %v2189_v39, %v1866_v7  ;;  %v2309_v10 = vpop.f32.mrb[3].mxu0 }
 0x6ae   : > { %v3029_v11 = vadd.f32 %v1867_v8, %v2728_v9  ;;  %v1906_v9 = vld [vmem:[%s3172_s8 + $0x30] sm:$0xff] }
 0x6af   : > { %v2418_v18 = vpack.c.bf16 %v1907_v17, %v1906_v9 }
 0x6b0   : > { %1873 = vadd.xlane.f32.xlu0 %v3029_v11  ;;  %v1876_v12 = vmul.f32 %v3029_v11, %v3029_v11 }
 0x6b1   : > { %2419 = vmatpush3.bf16.msra.mxu1 %v2418_v18 }
 0x6b2   : > { %1877 = vadd.xlane.f32.xlu1 %v1876_v12  ;;  %2420 = vmatprep.subr.bf16.mxu1 %v2590_v1 }
 0x6b5   : > { %2422 = vmatpush3.bf16.msra.mxu1 %v2421_v23 }
 0x6b6   : > { %2423 = vmatprep.subr.bf16.mxu1 %v2590_v1 }
 0x6b9   : > { %2425 = vmatpush3.bf16.msra.mxu1 %v2424_v25 }
 0x6ba   : > { %2426 = vmatprep.subr.bf16.mxu1 %v2590_v1 }
 0x6bd   : > { %2428 = vmatpush3.bf16.msra.mxu1 %v2427_v28 }
 0x6be   : > { %2429 = vmatprep.subr.bf16.mxu1 %v2590_v1  ;;  %v2192_v1 = vld [vmem:[%s3171_s7] ss:$0 sm:$0xff] }
 0x6c1   : > { %2431 = vmatpush3.bf16.msra.mxu1 %v2430_v2 }
 0x73d   : > { %v1874_v41 = vpop.xlane.xlu0 %1873 }
 0x73e   : > { %v1875_v42 = vmul.f32 0.03125, %v1874_v41 }
 0x73f   : > { %v1878_v43 = vpop.xlane.xlu1 %1877 }
 0x740   : > { %v1880_v44 = vmul.f32 %v1875_v42, %v1875_v42  ;;  %v1879_v45 = vmul.f32 0.03125, %v1878_v43  ;;  %v1882_v48 = vsub.f32 %v3029_v11, %v1875_v42 }
 0x742   : > { %v1881_v46 = vsub.f32 %v1879_v45, %v1880_v44 }
 0x744   : > { %v1883_v47 = vadd.f32 1e-05, %v1881_v46 }
 0x746   : > { %2513 = vrsqrt.f32 %v1883_v47 }
 0x750   : > { %v2514_v49 = vpop.eup %2513 }
 0x751   : > { %v1885_v51 = vmul.f32 %v2514_v49, %v1882_v48 }
 0x753   : > { %v1892_v52 = vmul.f32 %v2191_v50, %v1885_v51 }
 0x755   : > { %v1899_v53 = vadd.f32 %v2192_v1, %v1892_v52 }
 0x757   : > { %2343 = vmatmul.mubr.f32.vlgmr.msra.gmra.mrb[16].mxu1 %v1899_v53 }
 0x82a   : > { %v1989_v58 = vpop.f32.mrb[16].mxu1 }
 0x82b   : > { %v1990_v15 = vadd.f32 %v2193_v57, %v1989_v58  ;;  %v2344_v60 = vpop.f32.mrb[17].mxu1 }
 0x82d   : > { %v1993_v59 = vmax.f32 %v1990_v15, 0.0 }
 0x82f   : > { %2362 = vmatmul.mubr.msk.f32.vlgmr.msra.gmra.mrb[4].mxu0 %vm1796_vm5, %v1993_v59 }
 0x902   : > { %v2078_v62 = vpop.f32.mrb[4].mxu0 }
 0x903   : > { %v2079_v21 = vadd.f32 %v2194_v61, %v2078_v62  ;;  %v2363_v63 = vpop.f32.mrb[5].mxu0 }
 0x905   : > { %v2082_v0 = vadd.f32 %v2079_v21, %v3029_v11 }
 0x907   : > { %2083 = vst [vmem:[%s404_s23] sm:$0xff] %v2082_v0 }
 0x908   : > { %2528 = shalt.err (!%p2525_p3)
}
 0x909   : > { %s2529_s18 = scalar_lea.hbm %s3122_s17, 128  ;;  %s2533_s15 = scalar_lea.hbm %s3176_s12, 256 }
 0x90a   : > { %p2530_p4 = scmp.ne.s32.totalorder %s3122_s17, %s2529_s18  ;;  %p2534_p9 = scmp.lt.u32.totalorder %s3122_s17, %s3176_s12 }
 0x90b   : > { %p2535_p10 = scmp.lt.u32.totalorder %s2533_s15, %s2529_s18  ;;  %p2537_p12 = scmp.lt.u32.totalorder %s2529_s18, %s3122_s17 }
 0x90c   : > { %p2531_p7 = pnand %p2530_p4, %p2695_p5 }
 0x90d   : > { %p2536_p11 = por %p2535_p10, %p2534_p9 }
 0x90e   : > { %p2532_p8 = pneg %p2531_p7 }
 0x90f   : > { %p2538_p13 = por %p2537_p12, %p2536_p11 }
 0x911   : > { %p2539_p0 = pnand %p2538_p13, %p2532_p8 }
 0x913   : > { %2542 = shalt.err (!%p2539_p0)
}
 0x914   : > { %2444 = dma.vmem_to_hbm [thread:$0]  (%p2695_p5), %s3124_s26, 128, %s3122_s17, %s2085_s30  }
 0x915 PF: > { %p2450_p1 = scmp.ge.s32.totalorder %s2577_s24, 2  ;;  %s2110_s29 = sand.u32 1, %s2565_s21  }
 0x916   : > { %s2111_s28 = scalar_lea.sflag [#allocation3], %s2110_s29 }
 0x917   : > { %p2447_p2 = pnand %p2450_p1, %p2699_p6 }
 0x919   : > { %2560 = dma.done.wait (!%p2447_p2), %s2111_s28, 128  }
 0x91a   : > { %2562 = vsyncadd (!%p2447_p2), %s2111_s28, 4294967168  ;;  %s3182_s19 = sld [smem:[#allocation5_spill]]  ;;  %s3183_s23 = sld [smem:[#allocation6_spill]] }
 0x91b   : > { %p22_p3 = scmp.ge.s32.totalorder %s2682_s27, 4   ;;  %s3184_s21 = smov %s2569_s22 }
 0x91c   : > { %s3186_s24 = smov %s2682_s27 }
 0x91d   :  { %24 = sbr.rel (!%p22_p3) target bundleno = 3 (0x3), region = 103 }
 0x920   : > { %s3185_s22 = smov %s3182_s19 }
 0x924   :  { %2116 = vsyncpa [#allocation3], 1 }
 0x925   :  { %2118 = vsyncpa [#allocation3 + $0x1], 1 }

</bundles_post_ra>
